<compile_context>
chip_gen: v5e
topology: v5e:2x2
jax: 0.10.0
libtpu: 0.0.40
codegen_flags: <defaults>
</compile_context>

<pallas_src>
import functools

import jax
import jax.numpy as jnp
from jax import lax
from jax.experimental import pallas as pl
from jax.experimental.pallas import tpu as pltpu

LN_EPS = 1e-5  # PyTorch nn.LayerNorm default


# ----------------------------------------------------------------------------
# Kernel: one batch element per grid step.
# ----------------------------------------------------------------------------
def _msl_kernel(x_ref, static_ref, xs_ref, wd_ref, bd_ref, wg_ref, bg_ref,
                gamma_ref, beta_ref, out_ref, fusion_ref, *, row_tile):
    N, D = x_ref.shape

    x = x_ref[...]                                     # (N, D) this batch's nodes
    static = static_ref[...]                           # (N, D) embed1 table

    # --- time_norm = nn.LayerNorm([in_dim]) over last dim ---
    mu = jnp.mean(x, axis=-1, keepdims=True)
    var = jnp.mean((x - mu) ** 2, axis=-1, keepdims=True)
    xn = (x - mu) * lax.rsqrt(var + LN_EPS) * gamma_ref[...] + beta_ref[...]

    # --- gated fusion: static path precomputed in wrapper (xs_ref), dynamic here ---
    xd = jnp.dot(xn, wd_ref[...],
                 preferred_element_type=jnp.float32) + bd_ref[...]   # (N, D)
    z = jax.nn.sigmoid(xs_ref[...] + xd)
    h = xn + z * (static - xn)                          # == z*static + (1-z)*xn
    fusion = jnp.tanh(h) + static                       # (N, D)
    fusion_ref[...] = fusion                            # VMEM copy for ref-slicing

    # --- graph_learn + graph aggregate + graph_update, flash-style row panels ---
    # Never hold the full (N, N) adjacency: per panel, sigmoid then contract.
    num_panels = N // row_tile

    @pl.loop(0, num_panels)
    def _(p):
        r = pl.multiple_of(p * row_tile, row_tile)
        f_p = fusion_ref[pl.ds(r, row_tile), :]                       # (row_tile, D)
        adj_p = jax.nn.sigmoid(lax.dot_general(
            f_p, fusion,
            dimension_numbers=(((1,), (1,)), ((), ())),               # f_p @ fusion^T
            preferred_element_type=jnp.float32))                      # (row_tile, N)
        agg_p = jnp.dot(adj_p, fusion,
                        preferred_element_type=jnp.float32)           # (row_tile, D)
        out_p = jnp.dot(agg_p, wg_ref[...],
                        preferred_element_type=jnp.float32) + bg_ref[...]
        out_ref[pl.ds(r, row_tile), :] = out_p.astype(out_ref.dtype)  # unmasked vst


# ----------------------------------------------------------------------------
# Helpers
# ----------------------------------------------------------------------------
def _layernorm_ref(x, gamma, beta):
    mu = jnp.mean(x, axis=-1, keepdims=True)
    var = jnp.mean((x - mu) ** 2, axis=-1, keepdims=True)
    return (x - mu) * lax.rsqrt(var + LN_EPS) * gamma + beta


def _pick_row_tile(n):
    for t in (256, 128, 64, 32, 16, 8):
        if n % t == 0:
            return t
    return n  # odd N: single full panel


def _vmem_limit_bytes(N, D, MP, row_tile):
    f32 = 4
    elems = (
        2 * N * D                       # x block, double-buffered
        + 2 * N * MP                    # out block, double-buffered
        + 2 * 2 * N * D                 # static + xs (buffered)
        + 2 * (D * D + D * MP + MP + 3 * D)   # weights / biases
        + N * D                         # fusion scratch
        + row_tile * (N + D + MP)       # per-panel temporaries
        + 4 * N * D                     # elementwise temporaries slack
    )
    est = 2 * elems * f32 + (1 << 20)
    return int(min(max(est, 16 * 1024 * 1024), 48 * 1024 * 1024))


# ----------------------------------------------------------------------------
# Forward wrapper
# ----------------------------------------------------------------------------
def msl_incre_forward(x, params, incre=False):
    """JAX/Pallas equivalent of MSLIncre.forward.

    x: (B, N_dyn, in_dim) float32.
    Returns (output, new_embed2); the EMA update of embed2 is returned as a
    value (pure-functional) instead of mutating the params dict.
    """
    B, N, D = x.shape
    M = params["wg"].shape[1]
    MP = params["wg_padded"].shape[1]   # lane-dense output width (padded at init)

    gamma, beta = params["gamma"], params["beta"]

    # EMA update of embed2 from embed1 (parameter side effect in PyTorch).
    new_embed2 = params["embed2"] * params["m"] + params["embed1"] * (1.0 - params["m"])

    # --- incre branch (glue: split / pad / first LayerNorm) ---
    if incre:
        split = D - 1
        part1 = x[:, :, :split]
        part2 = x[:, :, split:]
        x_pad = jnp.concatenate(
            [part1, jnp.zeros((B, N, D - split), x.dtype)], axis=2)
        part2_incre = jnp.concatenate(
            [part2, jnp.zeros((B, N, D - part2.shape[2]), x.dtype)], axis=2)
        nodevec_fusion = _layernorm_ref(
            part2_incre, gamma[None, None, :], beta[None, None, :])
        node_input = x_pad + nodevec_fusion
    else:
        node_input = x  # + zeros

    # Batch-invariant static path, computed exactly once per forward.
    xs = params["embed1"] @ params["ws"] + params["bs"]          # (N, D)

    bd2 = params["bd"].reshape(1, D)
    g2 = gamma.reshape(1, D)
    b2 = beta.reshape(1, D)

    row_tile = _pick_row_tile(N)
    kernel = functools.partial(_msl_kernel, row_tile=row_tile)

    const = lambda b: (0, 0)   # batch-invariant operands
    out_padded = pl.pallas_call(
        kernel,
        out_shape=jax.ShapeDtypeStruct((B, N, MP), jnp.float32),
        grid_spec=pltpu.PrefetchScalarGridSpec(
            num_scalar_prefetch=0,
            grid=(B,),
            in_specs=[
                pl.BlockSpec((None, N, D), lambda b: (b, 0, 0)),   # x, per batch
                pl.BlockSpec((N, D), const),                        # embed1
                pl.BlockSpec((N, D), const),                        # xs (static path)
                pl.BlockSpec((D, D), const),                        # wd
                pl.BlockSpec((1, D), const),                        # bd
                pl.BlockSpec((D, MP), const),                       # wg (padded)
                pl.BlockSpec((1, MP), const),                       # bg (padded)
                pl.BlockSpec((1, D), const),                        # gamma
                pl.BlockSpec((1, D), const),                        # beta
            ],
            out_specs=pl.BlockSpec((None, N, MP), lambda b: (b, 0, 0)),
            scratch_shapes=[pltpu.VMEM((N, D), jnp.float32)],       # fusion buffer
        ),
        compiler_params=pltpu.CompilerParams(
            dimension_semantics=("parallel",),
            vmem_limit_bytes=_vmem_limit_bytes(N, D, MP, row_tile),
        ),
    )(node_input, params["embed1"], xs, params["wd"], bd2,
      params["wg_padded"], params["bg_padded"], g2, b2)

    out = out_padded[:, :, :M]
    return out, new_embed2


# ----------------------------------------------------------------------------
# Pure-JAX reference for correctness checking
# ----------------------------------------------------------------------------
def _reference_forward(x, params, incre=False):
    B, N, D = x.shape
    gamma, beta = params["gamma"], params["beta"]
    if incre:
        split = D - 1
        part1, part2 = x[:, :, :split], x[:, :, split:]
        x_pad = jnp.concatenate([part1, jnp.zeros((B, N, D - split), x.dtype)], axis=2)
        p2 = jnp.concatenate([part2, jnp.zeros((B, N, D - 1), x.dtype)], axis=2)
        node_input = x_pad + _layernorm_ref(p2, gamma, beta)
    else:
        node_input = x
    xn = _layernorm_ref(node_input, gamma, beta)
    static = params["embed1"]
    xs = static @ params["ws"] + params["bs"]
    xd = xn @ params["wd"] + params["bd"]
    z = jax.nn.sigmoid(xs[None] + xd)
    h = z * static[None] + (1 - z) * xn
    fusion = jnp.tanh(h) + static[None]
    adj = jax.nn.sigmoid(jnp.einsum("bnd,bmd->bnm", fusion, fusion))
    agg = jnp.einsum("bnm,bmd->bnd", adj, fusion)
    return agg @ params["wg"] + params["bg"]


# ----------------------------------------------------------------------------
# Params
# ----------------------------------------------------------------------------
def init_params(key, dynamic_nodes, in_dim, num_nodes, m):
    ks = jax.random.split(key, 8)
    s = lambda k, shape: (jax.random.normal(k, shape, jnp.float32) * 0.1)
    wg = s(ks[6], (in_dim, num_nodes))
    bg = s(ks[7], (num_nodes,))
    mp = ((num_nodes + 127) // 128) * 128
    # Lane-pad graph_update weights ONCE here (hoisted out of forward).
    wg_padded = jnp.zeros((in_dim, mp), jnp.float32).at[:, :num_nodes].set(wg)
    bg_padded = jnp.zeros((1, mp), jnp.float32).at[:, :num_nodes].set(bg)
    return {
        "embed1": s(ks[0], (dynamic_nodes, in_dim)),
        "embed2": s(ks[1], (dynamic_nodes, in_dim)),
        "ws": s(ks[2], (in_dim, in_dim)),     # stored in x@W convention
        "bs": s(ks[3], (in_dim,)),
        "wd": s(ks[4], (in_dim, in_dim)),
        "bd": s(ks[5], (in_dim,)),
        "wg": wg,                             # graph_update, x@W convention
        "bg": bg,
        "wg_padded": wg_padded,
        "bg_padded": bg_padded,
        "gamma": jnp.ones((in_dim,), jnp.float32),   # LayerNorm defaults
        "beta": jnp.zeros((in_dim,), jnp.float32),
        "m": jnp.float32(m),
    }


if __name__ == "__main__":
    batch = 2
    dynamic_nodes = 8
    in_dim = 32        # LayerNorm([in_dim]) applied along last axis
    num_nodes = 16
    m = 0.9

    key = jax.random.PRNGKey(0)
    kx, kp = jax.random.split(key)
    x = jax.random.normal(kx, (batch, dynamic_nodes, in_dim), jnp.float32)
    params = init_params(kp, dynamic_nodes, in_dim, num_nodes, m)

    out, new_embed2 = msl_incre_forward(x, params, incre=False)
    out = jax.block_until_ready(out)

    ref = _reference_forward(x, params, incre=False)
    ref_embed2 = params["embed2"] * params["m"] + params["embed1"] * (1.0 - params["m"])

    assert out.shape == (batch, dynamic_nodes, num_nodes)
    assert jnp.allclose(out, ref, atol=1e-4, rtol=1e-4)
    assert jnp.allclose(new_embed2, ref_embed2, atol=1e-6, rtol=1e-6)

    print("KERNEL_OK")
</pallas_src>

<mosaic_0001>
module attributes {stable_mosaic.version = 11 : i64} {
  func.func @_msl_kernel(%arg0: i32, %arg1: memref<1x8x32xf32, #tpu.memory_space<vmem>>, %arg2: memref<8x32xf32, #tpu.memory_space<vmem>>, %arg3: memref<8x32xf32, #tpu.memory_space<vmem>>, %arg4: memref<32x32xf32, #tpu.memory_space<vmem>>, %arg5: memref<1x32xf32, #tpu.memory_space<vmem>>, %arg6: memref<32x128xf32, #tpu.memory_space<vmem>>, %arg7: memref<1x128xf32, #tpu.memory_space<vmem>>, %arg8: memref<1x32xf32, #tpu.memory_space<vmem>>, %arg9: memref<1x32xf32, #tpu.memory_space<vmem>>, %arg10: memref<1x8x128xf32, #tpu.memory_space<vmem>>, %arg11: memref<8x32xf32, #tpu.memory_space<vmem>>) attributes {dimension_semantics = [#tpu.dimension_semantics<parallel>], iteration_bounds = array<i64: 2>, scalar_prefetch = 0 : i64, scratch_operands = 1 : i64, tpu.core_type = #tpu.core_type<tc>, window_params = [{transform_indices = @transform_0, window_bounds = array<i64: 1, 8, 32>}, {pipeline_mode = #tpu.pipeline_mode<synchronous>, transform_indices = @transform_1, window_bounds = array<i64: 8, 32>}, {pipeline_mode = #tpu.pipeline_mode<synchronous>, transform_indices = @transform_2, window_bounds = array<i64: 8, 32>}, {pipeline_mode = #tpu.pipeline_mode<synchronous>, transform_indices = @transform_3, window_bounds = array<i64: 32, 32>}, {pipeline_mode = #tpu.pipeline_mode<synchronous>, transform_indices = @transform_4, window_bounds = array<i64: 1, 32>}, {pipeline_mode = #tpu.pipeline_mode<synchronous>, transform_indices = @transform_5, window_bounds = array<i64: 32, 128>}, {pipeline_mode = #tpu.pipeline_mode<synchronous>, transform_indices = @transform_6, window_bounds = array<i64: 1, 128>}, {pipeline_mode = #tpu.pipeline_mode<synchronous>, transform_indices = @transform_7, window_bounds = array<i64: 1, 32>}, {pipeline_mode = #tpu.pipeline_mode<synchronous>, transform_indices = @transform_8, window_bounds = array<i64: 1, 32>}, {transform_indices = @transform_9, window_bounds = array<i64: 1, 8, 128>}]} {
    %c0 = arith.constant 0 : index
    %c0_0 = arith.constant 0 : index
    %c0_1 = arith.constant 0 : index
    %0 = vector.load %arg1[%c0, %c0_0, %c0_1] : memref<1x8x32xf32, #tpu.memory_space<vmem>>, vector<1x8x32xf32>
    %1 = vector.shape_cast %0 : vector<1x8x32xf32> to vector<8x32xf32>
    %c0_2 = arith.constant 0 : index
    %c0_3 = arith.constant 0 : index
    %2 = vector.load %arg2[%c0_2, %c0_3] : memref<8x32xf32, #tpu.memory_space<vmem>>, vector<8x32xf32>
    %cst = arith.constant dense<0.000000e+00> : vector<8xf32>
    %3 = vector.multi_reduction <add>, %1, %cst [1] : vector<8x32xf32> to vector<8xf32>
    %4 = vector.shape_cast %3 : vector<8xf32> to vector<8x1xf32>
    %cst_4 = arith.constant 3.200000e+01 : f32
    %5 = vector.broadcast %cst_4 : f32 to vector<8x1xf32>
    %6 = arith.divf %4, %5 : vector<8x1xf32>
    %7 = vector.broadcast %6 : vector<8x1xf32> to vector<8x32xf32>
    %8 = arith.subf %1, %7 : vector<8x32xf32>
    %9 = arith.mulf %8, %8 : vector<8x32xf32>
    %cst_5 = arith.constant dense<0.000000e+00> : vector<8xf32>
    %10 = vector.multi_reduction <add>, %9, %cst_5 [1] : vector<8x32xf32> to vector<8xf32>
    %11 = vector.shape_cast %10 : vector<8xf32> to vector<8x1xf32>
    %cst_6 = arith.constant 3.200000e+01 : f32
    %12 = vector.broadcast %cst_6 : f32 to vector<8x1xf32>
    %13 = arith.divf %11, %12 : vector<8x1xf32>
    %14 = vector.broadcast %6 : vector<8x1xf32> to vector<8x32xf32>
    %15 = arith.subf %1, %14 : vector<8x32xf32>
    %cst_7 = arith.constant 9.99999974E-6 : f32
    %16 = vector.broadcast %cst_7 : f32 to vector<8x1xf32>
    %17 = arith.addf %13, %16 : vector<8x1xf32>
    %18 = math.rsqrt %17 : vector<8x1xf32>
    %19 = vector.broadcast %18 : vector<8x1xf32> to vector<8x32xf32>
    %20 = arith.mulf %15, %19 : vector<8x32xf32>
    %c0_8 = arith.constant 0 : index
    %c0_9 = arith.constant 0 : index
    %21 = vector.load %arg8[%c0_8, %c0_9] : memref<1x32xf32, #tpu.memory_space<vmem>>, vector<1x32xf32>
    %22 = vector.broadcast %21 : vector<1x32xf32> to vector<8x32xf32>
    %23 = arith.mulf %20, %22 : vector<8x32xf32>
    %c0_10 = arith.constant 0 : index
    %c0_11 = arith.constant 0 : index
    %24 = vector.load %arg9[%c0_10, %c0_11] : memref<1x32xf32, #tpu.memory_space<vmem>>, vector<1x32xf32>
    %25 = vector.broadcast %24 : vector<1x32xf32> to vector<8x32xf32>
    %26 = arith.addf %23, %25 : vector<8x32xf32>
    %c0_12 = arith.constant 0 : index
    %c0_13 = arith.constant 0 : index
    %27 = vector.load %arg4[%c0_12, %c0_13] : memref<32x32xf32, #tpu.memory_space<vmem>>, vector<32x32xf32>
    %cst_14 = arith.constant dense<0.000000e+00> : vector<8x32xf32>
    %28 = tpu.matmul %26, %27, %cst_14 {dimension_numbers = #tpu.dot_dimension_numbers<[1], [0], [0], [1], [0, 0, 1, 1], [], []>} : vector<8x32xf32>, vector<32x32xf32>, vector<8x32xf32> -> vector<8x32xf32>
    %c0_15 = arith.constant 0 : index
    %c0_16 = arith.constant 0 : index
    %29 = vector.load %arg5[%c0_15, %c0_16] : memref<1x32xf32, #tpu.memory_space<vmem>>, vector<1x32xf32>
    %30 = vector.broadcast %29 : vector<1x32xf32> to vector<8x32xf32>
    %31 = arith.addf %28, %30 : vector<8x32xf32>
    %c0_17 = arith.constant 0 : index
    %c0_18 = arith.constant 0 : index
    %32 = vector.load %arg3[%c0_17, %c0_18] : memref<8x32xf32, #tpu.memory_space<vmem>>, vector<8x32xf32>
    %33 = arith.addf %32, %31 : vector<8x32xf32>
    %34 = arith.negf %33 : vector<8x32xf32>
    %35 = math.exp %34 : vector<8x32xf32>
    %cst_19 = arith.constant 1.000000e+00 : f32
    %36 = vector.broadcast %cst_19 : f32 to vector<8x32xf32>
    %37 = arith.addf %36, %35 : vector<8x32xf32>
    %38 = arith.divf %36, %37 : vector<8x32xf32>
    %39 = arith.subf %2, %26 : vector<8x32xf32>
    %40 = arith.mulf %38, %39 : vector<8x32xf32>
    %41 = arith.addf %26, %40 : vector<8x32xf32>
    %42 = math.tanh %41 : vector<8x32xf32>
    %43 = arith.addf %42, %2 : vector<8x32xf32>
    %c0_20 = arith.constant 0 : index
    %c0_21 = arith.constant 0 : index
    %44 = vector.load %arg11[%c0_20, %c0_21] : memref<8x32xf32, #tpu.memory_space<vmem>>, vector<8x32xf32>
    tpu.vector_store %arg11[%c0_20, %c0_21], %43 {strides = array<i32>} : memref<8x32xf32, #tpu.memory_space<vmem>>, vector<8x32xf32>,
    %c0_i32 = arith.constant 0 : i32
    %c1_i32 = arith.constant 1 : i32
    %45 = arith.muli %c0_i32, %c1_i32 : i32
    %c0_i32_22 = arith.constant 0 : i32
    %46 = arith.addi %c0_i32_22, %45 : i32
    %c8_i32 = arith.constant 8 : i32
    %47 = arith.muli %46, %c8_i32 : i32
    %48 = tpu.assume_multiple %47, 8 : i32
    %49 = arith.index_cast %48 : i32 to index
    %c0_23 = arith.constant 0 : index
    %50 = vector.load %arg11[%49, %c0_23] : memref<8x32xf32, #tpu.memory_space<vmem>>, vector<8x32xf32>
    %cst_24 = arith.constant dense<0.000000e+00> : vector<8x8xf32>
    %51 = tpu.matmul %50, %43, %cst_24 {dimension_numbers = #tpu.dot_dimension_numbers<[1], [1], [0], [0], [0, 0, 1, 0], [], []>} : vector<8x32xf32>, vector<8x32xf32>, vector<8x8xf32> -> vector<8x8xf32>
    %52 = arith.negf %51 : vector<8x8xf32>
    %53 = math.exp %52 : vector<8x8xf32>
    %cst_25 = arith.constant 1.000000e+00 : f32
    %54 = vector.broadcast %cst_25 : f32 to vector<8x8xf32>
    %55 = arith.addf %54, %53 : vector<8x8xf32>
    %56 = arith.divf %54, %55 : vector<8x8xf32>
    %cst_26 = arith.constant dense<0.000000e+00> : vector<8x32xf32>
    %57 = tpu.matmul %56, %43, %cst_26 {dimension_numbers = #tpu.dot_dimension_numbers<[1], [0], [0], [1], [0, 0, 1, 1], [], []>} : vector<8x8xf32>, vector<8x32xf32>, vector<8x32xf32> -> vector<8x32xf32>
    %c0_27 = arith.constant 0 : index
    %c0_28 = arith.constant 0 : index
    %58 = vector.load %arg6[%c0_27, %c0_28] : memref<32x128xf32, #tpu.memory_space<vmem>>, vector<32x128xf32>
    %cst_29 = arith.constant dense<0.000000e+00> : vector<8x128xf32>
    %59 = tpu.matmul %57, %58, %cst_29 {dimension_numbers = #tpu.dot_dimension_numbers<[1], [0], [0], [1], [0, 0, 1, 1], [], []>} : vector<8x32xf32>, vector<32x128xf32>, vector<8x128xf32> -> vector<8x128xf32>
    %c0_30 = arith.constant 0 : index
    %c0_31 = arith.constant 0 : index
    %60 = vector.load %arg7[%c0_30, %c0_31] : memref<1x128xf32, #tpu.memory_space<vmem>>, vector<1x128xf32>
    %61 = vector.broadcast %60 : vector<1x128xf32> to vector<8x128xf32>
    %62 = arith.addf %59, %61 : vector<8x128xf32>
    %c0_32 = arith.constant 0 : index
    %63 = arith.index_cast %48 : i32 to index
    %c0_33 = arith.constant 0 : index
    %64 = vector.load %arg10[%c0_32, %63, %c0_33] : memref<1x8x128xf32, #tpu.memory_space<vmem>>, vector<1x8x128xf32>
    %65 = vector.shape_cast %64 : vector<1x8x128xf32> to vector<8x128xf32>
    %66 = vector.shape_cast %62 : vector<8x128xf32> to vector<1x8x128xf32>
    tpu.vector_store %arg10[%c0_32, %63, %c0_33], %66 {strides = array<i32>} : memref<1x8x128xf32, #tpu.memory_space<vmem>>, vector<1x8x128xf32>,
    %c1_i32_34 = arith.constant 1 : i32
    return
  }
  func.func @transform_0(%arg0: i32) -> (i32, i32, i32) {
    %c0_i32 = arith.constant 0 : i32
    %c0_i32_0 = arith.constant 0 : i32
    %c0_i32_1 = arith.constant 0 : i32
    return %arg0, %c0_i32, %c0_i32_0 : i32, i32, i32
  }
  func.func @transform_1(%arg0: i32) -> (i32, i32) {
    %c0_i32 = arith.constant 0 : i32
    %c0_i32_0 = arith.constant 0 : i32
    %c0_i32_1 = arith.constant 0 : i32
    return %c0_i32, %c0_i32_0 : i32, i32
  }
  func.func @transform_2(%arg0: i32) -> (i32, i32) {
    %c0_i32 = arith.constant 0 : i32
    %c0_i32_0 = arith.constant 0 : i32
    %c0_i32_1 = arith.constant 0 : i32
    return %c0_i32, %c0_i32_0 : i32, i32
  }
  func.func @transform_3(%arg0: i32) -> (i32, i32) {
    %c0_i32 = arith.constant 0 : i32
    %c0_i32_0 = arith.constant 0 : i32
    %c0_i32_1 = arith.constant 0 : i32
    return %c0_i32, %c0_i32_0 : i32, i32
  }
  func.func @transform_4(%arg0: i32) -> (i32, i32) {
    %c0_i32 = arith.constant 0 : i32
    %c0_i32_0 = arith.constant 0 : i32
    %c0_i32_1 = arith.constant 0 : i32
    return %c0_i32, %c0_i32_0 : i32, i32
  }
  func.func @transform_5(%arg0: i32) -> (i32, i32) {
    %c0_i32 = arith.constant 0 : i32
    %c0_i32_0 = arith.constant 0 : i32
    %c0_i32_1 = arith.constant 0 : i32
    return %c0_i32, %c0_i32_0 : i32, i32
  }
  func.func @transform_6(%arg0: i32) -> (i32, i32) {
    %c0_i32 = arith.constant 0 : i32
    %c0_i32_0 = arith.constant 0 : i32
    %c0_i32_1 = arith.constant 0 : i32
    return %c0_i32, %c0_i32_0 : i32, i32
  }
  func.func @transform_7(%arg0: i32) -> (i32, i32) {
    %c0_i32 = arith.constant 0 : i32
    %c0_i32_0 = arith.constant 0 : i32
    %c0_i32_1 = arith.constant 0 : i32
    return %c0_i32, %c0_i32_0 : i32, i32
  }
  func.func @transform_8(%arg0: i32) -> (i32, i32) {
    %c0_i32 = arith.constant 0 : i32
    %c0_i32_0 = arith.constant 0 : i32
    %c0_i32_1 = arith.constant 0 : i32
    return %c0_i32, %c0_i32_0 : i32, i32
  }
  func.func @transform_9(%arg0: i32) -> (i32, i32, i32) {
    %c0_i32 = arith.constant 0 : i32
    %c0_i32_0 = arith.constant 0 : i32
    %c0_i32_1 = arith.constant 0 : i32
    return %arg0, %c0_i32, %c0_i32_0 : i32, i32, i32
  }
}

</mosaic_0001>

<bundles_post_ra>
// kernel: tpu_custom_call.1
= control target key start
LH: loop header
LB: loop body
LE: loop exit
PB: predicated region body
PF: predicated region fallthrough
CT: control target
= control target key end

     0   :  { %s1346_s0 = inlined_call_operand.hbm [shape: f32[2,8,32], index: 0, kind: input, shape index: {}]   ;;  %s1347_s1 = inlined_call_operand.hbm [shape: f32[8,32], index: 1, kind: input, shape index: {}]   ;;  %s1348_s2 = inlined_call_operand.hbm [shape: f32[8,32], index: 2, kind: input, shape index: {}]   ;;  %s1349_s3 = inlined_call_operand.hbm [shape: f32[32,32], index: 3, kind: input, shape index: {}]   ;;  %s1350_s4 = inlined_call_operand.vmem [shape: f32[1,32], index: 4, kind: input, shape index: {}]   ;;  %s1351_s5 = inlined_call_operand.hbm [shape: f32[32,128], index: 5, kind: input, shape index: {}]   ;;  %s1352_s6 = inlined_call_operand.vmem [shape: f32[1,128], index: 6, kind: input, shape index: {}]   ;;  %s1353_s7 = inlined_call_operand.vmem [shape: f32[1,32], index: 7, kind: input, shape index: {}]   ;;  %s1354_s8 = inlined_call_operand.vmem [shape: f32[1,32], index: 8, kind: input, shape index: {}]   ;;  %s1355_s9 = inlined_call_operand.hbm [shape: f32[2,8,128], index: 9, kind: output, shape index: {}]  }
   0x1   :  { %1356 = sst [smem:[#allocation17_spill]] %s1347_s1 }
   0x2   :  { %1357 = sst [smem:[#allocation18_spill]] %s1348_s2 }
   0x3   :  { %1358 = sst [smem:[#allocation19_spill]] %s1349_s3 }
   0x4   :  { %1359 = sst [smem:[#allocation20_spill]] %s1351_s5 }
   0x5   :  { %14 = vsyncpa [#allocation4], 0 }
   0x6   :  { %16 = vsyncpa [#allocation4 + $0x1], 0 }
   0x7   :  { %17 = vsyncpa [#allocation7], 0 }
   0x8   :  { %18 = vsyncpa [#allocation10], 0 }
   0x9   :  { %19 = vsyncpa [#allocation5], 0 }
   0xa   :  { %21 = vsyncpa [#allocation5 + $0x1], 0  ;;  %s1156_s30 = smov 0   ;;  %s1158_s10 = smov 0  }
   0xb   :  { %s1160_s11 = smov 0   ;;  %s1162_s12 = smov 0  }
   0xc LB: > { %s1360_s1 = sld [smem:[#allocation17_spill]]  ;;  %s1180_s16 = sadd.s32 4294967295, %s1097_s12   ;;  %s1097_s12 = sphi %s1162_s12, %s1375_s12   ;;  %s1093_s11 = sphi %s1160_s11, %s1374_s11   ;;  %s1089_s10 = sphi %s1158_s10, %s1373_s10   ;;  %s1085_s30 = sphi %s1156_s30, %s1372_s30  }
   0xd   : > { %p739_p0 = scmp.ge.s32.totalorder %s1097_s12, 1  ;;  %p48_p1 = scmp.eq.s32.totalorder %s1180_s16, 0 }
   0xe   : > { %p252_p2 = scmp.lt.s32.totalorder %s1097_s12, 3  ;;  %s1099_s18 = smov [#allocation6]  }
   0xf   : > { %s266_s19 = sshll.u32 %s1099_s18, 4  ;;  %s1362_s3 = sld [smem:[#allocation19_spill]]  ;;  %s267_s19 = int_to_ptr.vmem [resolvable:$true] %s266_s19 }
  0x10   : > { %p1185_p3 = pnand %p739_p0, %p252_p2  ;;  %s1100_s24 = smov [#allocation9]  }
  0x11   : > { %s289_s25 = sshll.u32 %s1100_s24, 4  ;;  %s1101_s26 = smov 128   ;;  %s290_s25 = int_to_ptr.vmem [resolvable:$true] %s289_s25 }
  0x12   : > { %s264_s15 = sshll.u32 %s1360_s1, 4  ;;  %p785_p5 = pneg %p1185_p3  ;;  %s265_s15 = int_to_ptr.hbm [resolvable:$true] %s264_s15 }
  0x13   : > { %s1102_s27 = smov 8   ;;  %s1364_s2 = sld [smem:[#allocation18_spill]] }
  0x14   : > { %p1197_p6 = pnand %p785_p5, %p48_p1  ;;  %s1103_s14 = smov [#allocation8]  }
  0x15   : > { %s287_s22 = sshll.u32 %s1362_s3, 4  ;;  %s278_s18 = sshll.u32 %s1103_s14, 4  ;;  %s288_s22 = int_to_ptr.hbm [resolvable:$true] %s287_s22  ;;  %s279_s18 = int_to_ptr.vmem [resolvable:$true] %s278_s18 }
  0x16   : > { %788 = dma.hbm_to_vmem [thread:$0]  (!%p1197_p6), %s265_s15, 128, %s267_s19, [#allocation7]  }
  0x17   : > { %794 = dma.hbm_to_vmem [thread:$0]  (!%p1197_p6), %s288_s22, 512, %s290_s25, [#allocation10], %s1101_s26, %s1101_s26, %s1102_s27  }
  0x18   : > { %s1365_s5 = sld [smem:[#allocation20_spill]]  ;;  %s1104_s21 = smov [#allocation11]  }
  0x19   : > { %s276_s13 = sshll.u32 %s1364_s2, 4  ;;  %s306_s22 = sshll.u32 %s1104_s21, 4  ;;  %s277_s13 = int_to_ptr.hbm [resolvable:$true] %s276_s13  ;;  %s307_s22 = int_to_ptr.vmem [resolvable:$true] %s306_s22 }
  0x1a   : > { %791 = dma.hbm_to_vmem [thread:$0]  (!%p1197_p6), %s277_s13, 128, %s279_s18, [#allocation7]  }
  0x1b   : > { %s738_s24 = sadd.s32 4294967294, %s1097_s12   ;;  %s1217_s25 = sadd.s32 1, %s1097_s12  }
  0x1c   : > { %s31_s28 = ssub.s32 %s1097_s12, %s1217_s25  ;;  %s34_s29 = sadd.s32 1, %s1093_s11 }
  0x1d   : > { %p32_p7 = scmp.eq.s32.totalorder %s31_s28, 0  ;;  %p41_p8 = scmp.ne.s32.totalorder %s1093_s11, %s1089_s10 }
  0x1e   : > { %s304_s20 = sshll.u32 %s1365_s5, 4  ;;  %p42_p9 = scmp.eq.s32.totalorder %s1097_s12, 0  ;;  %s305_s20 = int_to_ptr.hbm [resolvable:$true] %s304_s20 }
  0x1f   : > { %797 = dma.hbm_to_vmem [thread:$0]  (!%p1197_p6), %s305_s20, 512, %s307_s22, [#allocation10], %s1101_s26, %s1101_s26, %s1102_s27  }
  0x20   : > { %p47_p10 = scmp.ne.s32.totalorder %s1089_s10, %s1085_s30  ;;  %p1230_p11 = por %p42_p9, %p41_p8 }
  0x21   : > { %s1228_s13 = scalar_select %p32_p7, %s1093_s11, %s34_s29  }
  0x22   : > { %p1236_p12 = por %p48_p1, %p47_p10  ;;  %p239_p13 = scmp.eq.s32.totalorder %s1180_s16, 1 }
  0x23   : > { %p245_p0 = scmp.eq.s32.totalorder %s738_s24, 1  ;;  %p810_p2 = scmp.lt.s32.totalorder %s1097_s12, 2 }
  0x24   : > { %s329_s26 = sand.u32 1, %s1093_s11   ;;  %p1243_p5 = por %p239_p13, %p41_p8 }
  0x25   : > { %p1247_p6 = por %p245_p0, %p47_p10  ;;  %s745_s15 = sshll.u32 %s329_s26, 3 }
  0x26   : > { %s746_s19 = sshll.u32 %s1097_s12, 3  ;;  %s333_s28 = scalar_lea.vmem [#allocation3], %s745_s15 }
  0x27   : > { %s337_s22 = scalar_lea.hbm %s1346_s0, %s746_s19  ;;  %s341_s29 = sshll.u32 %s333_s28, 4  ;;  %s342_s29 = int_to_ptr.vmem [resolvable:$true] %s341_s29 }
  0x28   : > { %s339_s1 = sshll.u32 %s337_s22, 4  ;;  %p1257_p7 = pnand %p810_p2, %p1230_p11  ;;  %s340_s1 = int_to_ptr.hbm [resolvable:$true] %s339_s1 }
  0x29   : > { %s330_s2 = scalar_lea.sflag [#allocation4], %s329_s26  ;;  %s993_s3 = sshra.s32 %s340_s1, 4  ;;  %s994_s3 = int_to_ptr.hbm [resolvable:$true] %s993_s3 }
  0x2a   : > { %s995_s5 = scalar_lea.hbm %s994_s3, 8  ;;  %p997_p9 = pneg %p1257_p7 }
  0x2b   : > { %p996_p8 = scmp.ne.s32.totalorder %s994_s3, %s995_s5  ;;  %s1000_s20 = scalar_lea.hbm %s1346_s0, 16 }
  0x2c   : > { %p1001_p11 = scmp.lt.s32.totalorder %s994_s3, %s1346_s0  ;;  %p1002_p0 = scmp.lt.s32.totalorder %s1000_s20, %s995_s5 }
  0x2d   : > { %p998_p10 = pnand %p997_p9, %p996_p8 }
  0x2e   : > { %p1003_p2 = por %p1002_p0, %p1001_p11 }
  0x2f   : > { %p999_p13 = pneg %p998_p10 }
  0x31   : > { %p1004_p4 = pnand %p1003_p2, %p999_p13 }
  0x33   : > { %1007 = shalt.err (!%p1004_p4)
}
  0x34   : > { %801 = dma.hbm_to_vmem [thread:$0]  (!%p1257_p7), %s340_s1, 128, %s342_s29, %s330_s2  }
  0x35   : > { %350 = sbr.rel (%p1185_p3) target bundleno = 934 (0x3a6), region = 56  ;;  %s1274_s26 = sand.u32 (!%p1185_p3), 1, %s1089_s10  }
  0x36   : > { %s748_s22 = sshll.u32 (!%p1185_p3), %s1274_s26, 3  ;;  %s353_s28 = scalar_lea.sflag (!%p1185_p3), [#allocation4], %s1274_s26 }
  0x37   : > { %s356_s3 = scalar_lea.vmem (!%p1185_p3), [#allocation3], %s748_s22 }
  0x3a   : > { %1068 = dma.done.wait (%p1236_p12), %s353_s28, 128  }
  0x3b   : > { %1070 = vsyncadd (%p1236_p12), %s353_s28, 4294967168 }
  0x3c   : > { %1072 = dma.done.wait (%p48_p1), [#allocation7], 256  }
  0x3d   : > { %1074 = vsyncadd (%p48_p1), [#allocation7], 4294967040 }
  0x3e   : > { %1076 = dma.done.wait (%p48_p1), [#allocation10], 1024  }
  0x3f   : > { %1078 = vsyncadd (%p48_p1), [#allocation10], 4294966272  ;;  %vm414_vm0 = vcmask 261120   ;;  %v412_v0 = vld [vmem:[%s356_s3] sm:$0xff]  ;;  %v1105_v2 = vmov 32.0   ;;  %v457_v14 = vld [vmem:[#allocation9 + $0x18] sm:$0xff] }
  0x40   : > { %v415_v1 = vsel %vm414_vm0, %v412_v0, 0.0  ;;  %859 = vrcp.f32 %v1105_v2  ;;  %477 = vmatpush.msra.mxu0 %v457_v14  ;;  %v456_v15 = vld [vmem:[#allocation9 + $0x10] sm:$0xff]  ;;  %v455_v16 = vld [vmem:[#allocation9 + $0x8] sm:$0xff]  ;;  %v454_v17 = vld [vmem:[#allocation9] sm:$0xff]  ;;  %vm558_vm12 = vcmask 64512   ;;  %s762_s24 = sshll.u32 %s1180_s16, 3 }
  0x41   : > { %416 = vadd.xlane.f32.xlu0 %v415_v1  ;;  %v855_v27 = vld [vmem:[%s1353_s7] ss:$0 sm:$0xff]  ;;  %v413_v47 = vld [vmem:[#allocation6] sm:$0xff]  ;;  %v583_v60 = vld [vmem:[#allocation11 + $0x8] sm:$0xff]  ;;  %s625_s20 = scalar_lea.hbm %s1355_s9, %s762_s24  ;;  %s411_s28 = scalar_lea.vmem [#allocation12], %s748_s22 }
  0x42   : > { %478 = vmatpush.msra.mxu0 %v456_v15  ;;  %v856_v30 = vld [vmem:[%s1354_s8] ss:$0 sm:$0xff]  ;;  %v584_v59 = vld [vmem:[#allocation11 + $0x10] sm:$0xff]  ;;  %s627_s3 = sshll.u32 %s411_s28, 4  ;;  %s629_s1 = sshll.u32 %s625_s20, 4  ;;  %s628_s3 = int_to_ptr.vmem [resolvable:$true] %s627_s3  ;;  %s630_s1 = int_to_ptr.hbm [resolvable:$true] %s629_s1 }
  0x43   : > { %v857_v33 = vld [vmem:[%s1350_s4] ss:$0 sm:$0xff]  ;;  %s615_s2 = scalar_lea.sflag [#allocation5], %s1274_s26  ;;  %s1037_s16 = sshra.s32 %s630_s1, 4  ;;  %s1038_s16 = int_to_ptr.hbm [resolvable:$true] %s1037_s16 }
  0x44   : > { %479 = vmatpush.msra.mxu0 %v455_v16  ;;  %v485_v35 = vld [vmem:[#allocation8] sm:$0xff]  ;;  %s1039_s5 = scalar_lea.hbm %s1038_s16, 8  ;;  %s1043_s29 = scalar_lea.hbm %s1355_s9, 16 }
  0x45   : > { %v585_v58 = vld [vmem:[#allocation11 + $0x18] sm:$0xff]  ;;  %p1040_p1 = scmp.ne.s32.totalorder %s1038_s16, %s1039_s5  ;;  %p1044_p12 = scmp.lt.s32.totalorder %s1038_s16, %s1355_s9 }
  0x46   : > { %v860_v3 = vpop.eup %859  ;;  %480 = vmatpush.msra.mxu0 %v454_v17  ;;  %605 = vmatpush.msra.mxu3 %v585_v58  ;;  %p1045_p7 = scmp.lt.s32.totalorder %s1043_s29, %s1039_s5 }
  0x47   : > { %v419_v4 = vmul.f32 32.0, %v860_v3  ;;  %vm423_vm1 = vweird.f32 %v860_v3  ;;  %p1041_p3 = pnand %p1040_p1, %p1243_p5 }
  0x48   : > { %606 = vmatpush.msra.mxu3 %v584_v59  ;;  %p1046_p8 = por %p1045_p7, %p1044_p12 }
  0x49   : > { %v420_v5 = vsub.f32 1.0, %v419_v4  ;;  %p1042_p4 = pneg %p1041_p3 }
  0x4a   : > { %607 = vmatpush.msra.mxu3 %v583_v60 }
  0x4b   : > { %v421_v6 = vmul.f32 %v860_v3, %v420_v5  ;;  %p1047_p9 = pnand %p1046_p8, %p1042_p4 }
  0x4d   : > { %v422_v7 = vadd.f32 %v860_v3, %v421_v6 }
  0x4f   : > { %v424_v8 = vsel %vm423_vm1, %v860_v3, %v422_v7 }
  0xb4   : > { %v417_v9 = vpop.xlane.xlu0 %416 }
  0xb5   : > { %v425_v10 = vmul.f32 %v424_v8, %v417_v9 }
  0xb7   : > { %v426_v11 = vsub.f32 %v412_v0, %v425_v10 }
  0xb9   : > { %v427_v12 = vmul.f32 %v426_v11, %v426_v11 }
  0xbb   : > { %v428_v13 = vsel %vm414_vm0, %v427_v12, 0.0 }
  0xbc   : > { %429 = vadd.xlane.f32.xlu0 %v428_v13  ;;  %v858_v13 = vld [vmem:[%s1352_s6] ss:$0 sm:$0xff] }
 0x12f   : > { %v430_v18 = vpop.xlane.xlu0 %429 }
 0x130   : > { %v431_v19 = vmul.f32 %v430_v18, %v424_v8 }
 0x132   : > { %v432_v20 = vadd.f32 1e-05, %v431_v19 }
 0x134   : > { %861 = vrsqrt.f32 %v432_v20  ;;  %vm439_vm3 = vweird.f32 %v432_v20 }
 0x13a   : > { %v862_v21 = vpop.eup %861 }
 0x13b   : > { %v434_v22 = vmul.f32 %v862_v21, %v432_v20  ;;  %vm440_vm2 = vweird.f32 %v862_v21 }
 0x13c   : > { %vm441_vm4 = vmor %vm439_vm3, %vm440_vm2 }
 0x13d   : > { %v435_v23 = vmul.f32 %v862_v21, %v434_v22 }
 0x13f   : > { %v436_v24 = vmul.f32 0.5, %v435_v23 }
 0x141   : > { %v437_v25 = vsub.f32 1.5, %v436_v24 }
 0x143   : > { %v438_v26 = vmul.f32 %v862_v21, %v437_v25 }
 0x145   : > { %v442_v28 = vsel %vm441_vm4, %v862_v21, %v438_v26 }
 0x146   : > { %v443_v29 = vmul.f32 %v442_v28, %v426_v11  ;;  %v582_v11 = vld [vmem:[#allocation11] sm:$0xff] }
 0x147   : > { %608 = vmatpush.msra.mxu3 %v582_v11 }
 0x148   : > { %v448_v31 = vmul.f32 %v855_v27, %v443_v29 }
 0x14a   : > { %v453_v32 = vadd.f32 %v856_v30, %v448_v31 }
 0x14c   : > { %754 = vmatmul.msk.f32.vlgmr.msra.gmra.mxu0 %vm414_vm0, %v453_v32  ;;  %v506_v51 = vsub.f32 %v413_v47, %v453_v32 }
 0x1c9   : > { %v482_v34 = vpop.f32.mrf.mxu0 }
 0x1ca   : > { %v483_v36 = vadd.f32 %v857_v33, %v482_v34 }
 0x1cc   : > { %v486_v37 = vadd.f32 %v485_v35, %v483_v36 }
 0x1ce   : > { %v755_v38 = vmul.f32 -1.442695, %v486_v37 }
 0x1d0   : > { %863 = vpow2.f32 %v755_v38 }
 0x1d6   : > { %v864_v39 = vpop.eup %863 }
 0x1d7   : > { %v490_v40 = vadd.f32 1.0, %v864_v39 }
 0x1d9   : > { %865 = vrcp.f32 %v490_v40  ;;  %v502_v44 = vand.u32 2147483648, %v490_v40  ;;  %v500_v46 = vand.u32 2147483647, %v490_v40  ;;  %vm496_vm6 = vweird.f32 %v490_v40 }
 0x1db   : > { %v503_v49 = vor.u32 1.1754944e-38, %v502_v44  ;;  %vm501_vm8 = vcmp.eq.f32.partialorder %v500_v46, 8.507059e+37 }
 0x1df   : > { %v866_v41 = vpop.eup %865 }
 0x1e0   : > { %v492_v42 = vmul.f32 %v866_v41, %v490_v40  ;;  %vm497_vm5 = vweird.f32 %v866_v41 }
 0x1e1   : > { %vm498_vm7 = vmor %vm496_vm6, %vm497_vm5 }
 0x1e2   : > { %v493_v43 = vsub.f32 1.0, %v492_v42 }
 0x1e4   : > { %v494_v45 = vmul.f32 %v866_v41, %v493_v43 }
 0x1e6   : > { %v495_v48 = vadd.f32 %v866_v41, %v494_v45 }
 0x1e8   : > { %v499_v50 = vsel %vm498_vm7, %v866_v41, %v495_v48 }
 0x1e9   : > { %v504_v52 = vsel %vm501_vm8, %v503_v49, %v499_v50 }
 0x1ea   : > { %v507_v53 = vmul.f32 %v506_v51, %v504_v52 }
 0x1ec   : > { %v508_v54 = vadd.f32 %v507_v53, %v453_v32 }
 0x1ee   : > { %867 = vtanh.f32 %v508_v54 }
 0x1f4   : > { %v868_v55 = vpop.eup %867 }
 0x1f5   : > { %v510_v56 = vadd.f32 %v868_v55, %v413_v47 }
 0x1f7   : > { %511 = vst.msk [vmem:[#allocation2] sm:$0xff] %vm414_vm0, %v510_v56  ;;  %756 = vmatpush.xpose.msk.msra.mxu1 %vm414_vm0, %v510_v56  ;;  %577 = vmatpush.msra.mxu2 %v510_v56 }
 0x1fe   : > { %v512_v57 = vld [vmem:[#allocation2] sm:$0xff] }
 0x1ff   : > { %757 = vmatmul.msk.f32.vlgmr.msra.gmra.mxu1 %vm414_vm0, %v512_v57 }
 0x27c   : > { %v536_v61 = vpop.f32.mrf.mxu1 }
 0x27d   : > { %v758_v62 = vmul.f32 -1.442695, %v536_v61 }
 0x27f   : > { %869 = vpow2.f32 %v758_v62 }
 0x285   : > { %v870_v63 = vpop.eup %869 }
 0x286   : > { %v542_v0 = vadd.f32 1.0, %v870_v63 }
 0x288   : > { %871 = vrcp.f32 %v542_v0  ;;  %v554_v4 = vand.u32 2147483648, %v542_v0  ;;  %v552_v6 = vand.u32 2147483647, %v542_v0  ;;  %vm548_vm10 = vweird.f32 %v542_v0 }
 0x28a   : > { %v555_v8 = vor.u32 1.1754944e-38, %v554_v4  ;;  %vm553_vm13 = vcmp.eq.f32.partialorder %v552_v6, 8.507059e+37 }
 0x28e   : > { %v872_v1 = vpop.eup %871 }
 0x28f   : > { %v544_v2 = vmul.f32 %v872_v1, %v542_v0  ;;  %vm549_vm9 = vweird.f32 %v872_v1 }
 0x290   : > { %vm550_vm11 = vmor %vm548_vm10, %vm549_vm9 }
 0x291   : > { %v545_v3 = vsub.f32 1.0, %v544_v2 }
 0x293   : > { %v546_v5 = vmul.f32 %v872_v1, %v545_v3 }
 0x295   : > { %v547_v7 = vadd.f32 %v872_v1, %v546_v5 }
 0x297   : > { %v551_v9 = vsel %vm550_vm11, %v872_v1, %v547_v7 }
 0x298   : > { %v556_v10 = vsel %vm553_vm13, %v555_v8, %v551_v9 }
 0x299   : > { %759 = vmatmul.msk.f32.vlgmr.msra.gmra.mxu2 %vm558_vm12, %v556_v10 }
 0x31c   : > { %v579_v12 = vpop.f32.mrf.mxu2 }
 0x31d   : > { %760 = vmatmul.msk.f32.vlgmr.msra.gmra.mxu3 %vm414_vm0, %v579_v12 }
 0x3a0   : > { %v610_v14 = vpop.f32.mrf.mxu3 }
 0x3a1   : > { %v611_v15 = vadd.f32 %v858_v13, %v610_v14 }
 0x3a3   : > { %613 = vst [vmem:[%s411_s28] sm:$0xff] %v611_v15 }
 0x3a4   : > { %1050 = shalt.err (!%p1047_p9)
}
 0x3a5   : > { %783 = dma.vmem_to_hbm [thread:$0]  (%p1243_p5), %s628_s3, 128, %s630_s1, %s615_s2  }
 0x3a6 PF: > { %s641_s26 = sand.u32 1, %s1085_s30   ;;  %p1371_p10 = scmp.ge.s32.totalorder %s1097_s12, 2 }
 0x3a7   : > { %s642_s15 = scalar_lea.sflag [#allocation5], %s641_s26 }
 0x3a8   : > { %p803_p13 = pnand %p1371_p10, %p1247_p6 }
 0x3aa   : > { %p804_p11 = pneg %p803_p13 }
 0x3ac   : > { %1080 = dma.done.wait (%p804_p11), %s642_s15, 128  }
 0x3ad   : > { %1082 = vsyncadd (%p804_p11), %s642_s15, 4294967168  ;;  %p24_p0 = scmp.ge.s32.totalorder %s1217_s25, 4   ;;  %s1372_s30 = smov %s1089_s10 }
 0x3ae   : > { %s1373_s10 = smov %s1093_s11  ;;  %s1374_s11 = smov %s1228_s13 }
 0x3af   : > { %s1375_s12 = smov %s1217_s25  ;;  %26 = sbr.rel (!%p24_p0) target bundleno = 12 (0xc), region = 117 }
 0x3b4   :  { %648 = vsyncpa [#allocation4], 1 }
 0x3b5   :  { %650 = vsyncpa [#allocation4 + $0x1], 1 }
 0x3b6   :  { %651 = vsyncpa [#allocation7], 1 }
 0x3b7   :  { %652 = vsyncpa [#allocation10], 1 }
 0x3b8   :  { %653 = vsyncpa [#allocation5], 1 }
 0x3b9   :  { %655 = vsyncpa [#allocation5 + $0x1], 1 }

</bundles_post_ra>
